<compile_context>
chip_gen: v5e
topology: v5e:2x2
jax: 0.10.0
libtpu: 0.0.40
codegen_flags: <defaults>
</compile_context>

<pallas_src>
import jax
import jax.numpy as jnp
from jax.experimental import pallas as pl
from jax.experimental.pallas import tpu as pltpu

# Below this size the custom-call dispatch overhead dominates the copy time
# on every TPU generation, so a plain XLA copy (or the no-kernel path) wins.
_SMALL_COPY_BYTES = 1 << 20


def _dma_copy_kernel(src_ref, dst_ref, sem):
    # Entire forward of `Bicubic`: dst = src, as a single HBM->HBM DMA.
    cp = pltpu.make_async_copy(src_ref, dst_ref, sem)
    cp.start()
    cp.wait()


def _materialized_copy(lms):
    """Fresh-buffer copy of `lms` via one direct HBM->HBM DMA (no VMEM staging)."""
    return pl.pallas_call(
        _dma_copy_kernel,
        out_shape=jax.ShapeDtypeStruct(lms.shape, lms.dtype),
        in_specs=[pl.BlockSpec(memory_space=pl.ANY)],
        out_specs=pl.BlockSpec(memory_space=pl.ANY),
        scratch_shapes=[pltpu.SemaphoreType.DMA(())],
    )(lms)


def bicubic_forward(x, lms, materialize=False, force_kernel=False):
    """Pallas equivalent of Bicubic.forward(x, lms) -> lms.

    `x` is accepted for API parity with the PyTorch module but is unused,
    exactly matching the reference semantics.

    - materialize=False (default): zero-cost passthrough (no kernel).
    - materialize=True: return a fresh buffer. Tiny tensors use a plain XLA
      copy; larger tensors (or force_kernel=True) use the Pallas HBM->HBM
      DMA copy kernel.
    """
    del x  # unused in the reference forward
    if not materialize:
        return lms  # optimal: identity requires zero work

    nbytes = lms.size * jnp.dtype(lms.dtype).itemsize
    if nbytes < _SMALL_COPY_BYTES and not force_kernel:
        # Sub-MiB tensor: pallas_call dispatch overhead exceeds the copy cost.
        return jnp.copy(lms)
    return _materialized_copy(lms)


if __name__ == "__main__":
    # Module construction args (Bicubic.__init__ creates no parameters).
    channels = 4
    scale_factor = 2

    key = jax.random.PRNGKey(0)
    kx, klms = jax.random.split(key)

    x = jax.random.normal(kx, (2, channels, 16, 16), dtype=jnp.float32)
    lms = jax.random.normal(
        klms, (2, channels, 16 * scale_factor, 16 * scale_factor),
        dtype=jnp.float32,
    )

    # Zero-cost passthrough path (reference semantics, optimal).
    out_fast = jax.block_until_ready(bicubic_forward(x, lms))
    assert out_fast.shape == lms.shape and out_fast.dtype == lms.dtype
    assert bool(jnp.all(out_fast == lms))

    # Pallas HBM->HBM DMA copy kernel, forced so it is validated even on
    # this small example tensor.
    fwd = jax.jit(
        lambda a, b: bicubic_forward(a, b, materialize=True, force_kernel=True)
    )
    out_kernel = jax.block_until_ready(fwd(x, lms))
    assert out_kernel.shape == lms.shape and out_kernel.dtype == lms.dtype
    assert bool(jnp.all(out_kernel == lms))

    print("KERNEL_OK")
</pallas_src>

<mosaic_0001>
module attributes {stable_mosaic.version = 11 : i64} {
  func.func @_dma_copy_kernel(%arg0: memref<2x4x32x32xf32, #tpu.memory_space<any>>, %arg1: memref<2x4x32x32xf32, #tpu.memory_space<any>>, %arg2: memref<!tpu.dma_semaphore, #tpu.memory_space<semaphore_mem>>) attributes {dimension_semantics = [], scalar_prefetch = 0 : i64, scratch_operands = 1 : i64, tpu.core_type = #tpu.core_type<tc>} {
    tpu.enqueue_dma source(%arg0 : memref<2x4x32x32xf32, #tpu.memory_space<any>>) target(%arg1 : memref<2x4x32x32xf32, #tpu.memory_space<any>>) target_semaphore(%arg2 : memref<!tpu.dma_semaphore, #tpu.memory_space<semaphore_mem>>)
    tpu.wait_dma2 semaphore(%arg2 : memref<!tpu.dma_semaphore, #tpu.memory_space<semaphore_mem>>) src(%arg0 : memref<2x4x32x32xf32, #tpu.memory_space<any>>) dst(%arg1 : memref<2x4x32x32xf32, #tpu.memory_space<any>>)
    return
  }
}

</mosaic_0001>

<bundles_post_ra>
// kernel: _lambda_.1
= control target key start
LH: loop header
LB: loop body
LE: loop exit
PB: predicated region body
PF: predicated region fallthrough
CT: control target
= control target key end

     0   :  { %s34_s12 = smov [#allocation2]   ;;  %s35_s13 = smov [#allocation3]   ;;  %s53_s0 = inlined_call_operand.hbm [shape: f32[2,4,32,32], index: 0, kind: input, shape index: {}]   ;;  %s54_s1 = inlined_call_operand.hbm [shape: f32[2,4,32,32], index: 1, kind: output, shape index: {}]  }
   0x1   :  { %s10_s8 = sshll.u32 %s53_s0, 4  ;;  %s12_s11 = sshll.u32 %s54_s1, 4  ;;  %s11_s8 = int_to_ptr.hbm [resolvable:$true] %s10_s8  ;;  %s13_s11 = int_to_ptr.hbm [resolvable:$true] %s12_s11 }
   0x2   :  { %s36_s14 = smov 0  }
   0x3   :  { %16 = dma.general %s11_s8, 4096, %s13_s11, %s34_s12, %s35_s13, [#allocation4], %s36_s14, 0  }
   0x4   :  { %32 = dma.done.wait [#allocation2], 4096 }
   0x5   :  { %33 = vsyncadd [#allocation2], 4294963200 }
   0x6   :  { %22 = vsyncmov [#allocation2] }
   0x9   :  { %s23_s15 = vpop.sfrf %22 }
   0xa   :  { %p28_p0 = scmp.ne.s32.totalorder %s23_s15, 0 }
   0xc   :  { %27 = shalt.err (%p28_p0)  }

</bundles_post_ra>
